<compile_context>
chip_gen: v7x
topology: tpu7x:2x2x1
jax: 0.10.0
libtpu: 0.0.40
codegen_flags: <defaults>
</compile_context>

<pallas_src>
import functools

import jax
import jax.numpy as jnp
from jax.experimental import pallas as pl
from jax.experimental.pallas import tpu as pltpu


def _gem_kernel(p_ref, x_ref, o_ref, *, eps, lowp_pow):
    # p_ref: SMEM (1,) float32 learnable exponent (GeM's `p` Parameter)
    # x_ref: VMEM (block_rows, HW) tile of the flattened input
    # o_ref: VMEM (block_rows, 1) pooled output
    p = p_ref[0]
    x = x_ref[...]
    if lowp_pow:
        # bf16 inputs: run clamp + x**p (exp/log) on the bf16 EUP path
        # (v6e/v7x); accumulate the mean in f32 to preserve accuracy.
        xc = jnp.maximum(x, jnp.asarray(eps, x.dtype))       # x.clamp(min=eps)
        xp = jnp.power(xc, p.astype(x.dtype)).astype(jnp.float32)  # .pow(p)
    else:
        xc = jnp.maximum(x.astype(jnp.float32), eps)          # x.clamp(min=eps)
        xp = jnp.power(xc, p)                                 # .pow(p)
    m = jnp.mean(xp, axis=-1, keepdims=True)                  # avg over (H, W)
    o_ref[...] = jnp.power(m, 1.0 / p).astype(o_ref.dtype)    # .pow(1/p)


def _pick_block_rows(nc, hw, itemsize):
    # Target ~4 MiB per input tile: with double-buffering that is ~8 MiB of
    # VMEM -- big enough to reach ~85% of HBM roofline, small enough for the
    # v5e 16 MiB scoped default and v7x's 64 MiB physical VMEM.
    target_bytes = 4 * 1024 * 1024
    rows = target_bytes // max(1, hw * itemsize)
    rows = max(8, (rows // 8) * 8)          # sublane multiple of 8
    if rows >= nc:
        return nc                           # single block = full row dim (legal)
    return int(rows)


def gem_pallas(x, p, eps=1e-06):
    """GeM pooling. x: (N, C, H, W) array, p: (1,) float32 parameter."""
    N, C, H, W = x.shape
    NC, HW = N * C, H * W
    x2d = x.reshape(NC, HW)
    itemsize = x.dtype.itemsize

    block_rows = _pick_block_rows(NC, HW, itemsize)
    grid = (pl.cdiv(NC, block_rows),)

    # Explicit VMEM budget: 2x (double-buffer) input + output tiles + headroom
    # for compiler-internal scratch. Portable across v5e/v6e/v7x defaults.
    in_tile_bytes = block_rows * HW * itemsize
    out_tile_bytes = block_rows * 1 * itemsize
    vmem_limit = min(2 * (in_tile_bytes + out_tile_bytes) + (4 << 20), 48 << 20)

    # Advisory cost estimate so XLA schedules surrounding ops around this
    # otherwise-opaque custom call. pow(p) lowers to log+exp per element.
    cost = pl.CostEstimate(
        flops=3 * NC * HW,
        transcendentals=2 * NC * HW + 2 * NC,
        bytes_accessed=NC * HW * itemsize + NC * itemsize + 4,
    )

    kernel = functools.partial(
        _gem_kernel, eps=eps, lowp_pow=(x.dtype == jnp.bfloat16))

    out2d = pl.pallas_call(
        kernel,
        out_shape=jax.ShapeDtypeStruct((NC, 1), x.dtype),
        grid_spec=pl.GridSpec(
            grid=grid,
            in_specs=[
                pl.BlockSpec(memory_space=pltpu.SMEM),             # p (scalar)
                pl.BlockSpec((block_rows, HW), lambda i: (i, 0)),  # x row-block
            ],
            out_specs=pl.BlockSpec((block_rows, 1), lambda i: (i, 0)),
        ),
        compiler_params=pltpu.CompilerParams(
            # Row blocks are independent -> shard across v7x's two TensorCores.
            dimension_semantics=("parallel",),
            vmem_limit_bytes=int(vmem_limit),
        ),
        cost_estimate=cost,
    )(p.astype(jnp.float32), x2d)

    # TODO(synk): for HW << 128 (e.g. 7x7 maps) an NHWC/(N*H*W, C) lane-dense
    # formulation with an f32 accumulator would recover padded-lane throughput.
    return out2d.reshape(N, C, 1, 1)


if __name__ == "__main__":
    key = jax.random.PRNGKey(0)
    N, C, H, W = 2, 4, 16, 16
    x = jax.random.uniform(key, (N, C, H, W), dtype=jnp.float32)

    # Deterministic parameter init, matching GeM.__init__: p = ones(1) * 3
    p = jnp.ones((1,), dtype=jnp.float32) * 3.0
    eps = 1e-06

    out = gem_pallas(x, p, eps)
    jax.block_until_ready(out)

    # Reference check (plain JAX) for the same semantics.
    ref = jnp.power(
        jnp.mean(jnp.power(jnp.maximum(x, eps), p[0]), axis=(2, 3),
                 keepdims=True),
        1.0 / p[0])
    assert out.shape == (N, C, 1, 1)
    assert jnp.allclose(out, ref, rtol=1e-5, atol=1e-6)

    print("KERNEL_OK")
</pallas_src>

<mosaic_0001>
module attributes {stable_mosaic.version = 11 : i64} {
  func.func @_gem_kernel(%arg0: i32, %arg1: memref<1xf32, #tpu.memory_space<smem>>, %arg2: memref<8x256xf32, #tpu.memory_space<vmem>>, %arg3: memref<8x1xf32, #tpu.memory_space<vmem>>) attributes {dimension_semantics = [#tpu.dimension_semantics<parallel>], iteration_bounds = array<i64: 1>, scalar_prefetch = 0 : i64, scratch_operands = 0 : i64, tpu.core_type = #tpu.core_type<tc>, window_params = [{transform_indices = @transform_0, window_bounds = array<i64: 1>}, {transform_indices = @transform_1, window_bounds = array<i64: 8, 256>}, {transform_indices = @transform_2, window_bounds = array<i64: 8, 1>}]} {
    %c0 = arith.constant 0 : index
    %0 = memref.load %arg1[%c0] : memref<1xf32, #tpu.memory_space<smem>>
    %c0_0 = arith.constant 0 : index
    %c0_1 = arith.constant 0 : index
    %1 = vector.load %arg2[%c0_0, %c0_1] : memref<8x256xf32, #tpu.memory_space<vmem>>, vector<8x256xf32>
    %cst = arith.constant 9.99999997E-7 : f32
    %2 = vector.broadcast %cst : f32 to vector<8x256xf32>
    %3 = arith.maximumf %1, %2 : vector<8x256xf32>
    %4 = vector.broadcast %0 : f32 to vector<8x256xf32>
    %5 = math.powf %3, %4 : vector<8x256xf32>
    %cst_2 = arith.constant dense<0.000000e+00> : vector<8xf32>
    %6 = vector.multi_reduction <add>, %5, %cst_2 [1] : vector<8x256xf32> to vector<8xf32>
    %7 = vector.shape_cast %6 : vector<8xf32> to vector<8x1xf32>
    %cst_3 = arith.constant 2.560000e+02 : f32
    %8 = vector.broadcast %cst_3 : f32 to vector<8x1xf32>
    %9 = arith.divf %7, %8 : vector<8x1xf32>
    %cst_4 = arith.constant 1.000000e+00 : f32
    %10 = arith.divf %cst_4, %0 : f32
    %11 = vector.broadcast %10 : f32 to vector<8x1xf32>
    %12 = math.powf %9, %11 : vector<8x1xf32>
    %c0_5 = arith.constant 0 : index
    %c0_6 = arith.constant 0 : index
    %13 = vector.load %arg3[%c0_5, %c0_6] : memref<8x1xf32, #tpu.memory_space<vmem>>, vector<8x1xf32>
    tpu.vector_store %arg3[%c0_5, %c0_6], %12 {strides = array<i32>} : memref<8x1xf32, #tpu.memory_space<vmem>>, vector<8x1xf32>,
    return
  }
  func.func @transform_0(%arg0: i32) -> i32 {
    %c0_i32 = arith.constant 0 : i32
    %c0_i32_0 = arith.constant 0 : i32
    return %c0_i32 : i32
  }
  func.func @transform_1(%arg0: i32) -> (i32, i32) {
    %c0_i32 = arith.constant 0 : i32
    %c0_i32_0 = arith.constant 0 : i32
    return %arg0, %c0_i32 : i32, i32
  }
  func.func @transform_2(%arg0: i32) -> (i32, i32) {
    %c0_i32 = arith.constant 0 : i32
    %c0_i32_0 = arith.constant 0 : i32
    return %arg0, %c0_i32 : i32, i32
  }
}

</mosaic_0001>

<bundles_post_ra>
// kernel: tpu_custom_call.1
= control target key start
LH: loop header
LB: loop body
LE: loop exit
PB: predicated region body
PF: predicated region fallthrough
CT: control target
= control target key end

     0   :  { %8 = vsyncpa [#allocation4], 0  ;;  %s248_s9 = smov [#allocation3]   ;;  %s476_s0 = inlined_call_operand.<no memory space> [shape: f32[1], index: 0, kind: input, shape index: {}]   ;;  %s477_s1 = inlined_call_operand.hbm [shape: f32[8,256], index: 1, kind: input, shape index: {}]   ;;  %s478_s2 = inlined_call_operand.vmem [shape: f32[8,1], index: 2, kind: output, shape index: {}]  }
   0x1   :  { %s17_s10 = sshll.u32 %s248_s9, 4  ;;  %s224_s13 = scalar_lea.hbm %s477_s1, 256  ;;  %s18_s10 = int_to_ptr.vmem [resolvable:$true] %s17_s10 }
   0x2   :  { %p225_p0 = scmp.ne.s32.totalorder %s477_s1, %s224_s13  ;;  %p228_p1 = scmp.lt.u32.totalorder %s224_s13, %s477_s1 }
   0x4   :  { %p230_p2 = pnand %p228_p1, %p225_p0 }
   0x6   :  { %233 = shalt.err (!%p230_p2)
}
   0x7   :  { %s234_s18 = scalar_lea.vmem %s18_s10, 256  ;;  %p239_p4 = scmp.lt.s32.totalorder %s18_s10, %s18_s10 }
   0x8   :  { %p235_p3 = scmp.ne.s32.totalorder %s18_s10, %s234_s18  ;;  %p240_p5 = scmp.lt.s32.totalorder %s234_s18, %s234_s18 }
   0xa   :  { %p241_p6 = por %p240_p5, %p239_p4 }
   0xc   :  { %p242_p7 = pnand %p241_p6, %p235_p3 }
   0xe   :  { %245 = shalt.err (!%p242_p7)
}
   0xf   :  { %20 = dma.hbm_to_vmem [thread:$0]  %s477_s1, 256, %s18_s10, [#allocation4]  }
  0x10   :  { %246 = dma.done.wait [#allocation4], 256  }
  0x11   :  { %247 = vsyncadd [#allocation4], 4294967040  ;;  %v281_v0 = vstv %s476_s0  ;;  %v25_v2 = vld [vmem:[#allocation3] sm:$0xff]  ;;  %v26_v3 = vld [vmem:[#allocation3 + $0x8] sm:$0xff]  ;;  %v249_v21 = vmov 2139095040   ;;  %v250_v27 = vmov 0  }
  0x12   :  { %v284_v1 = vand.u32 2147483647, %v281_v0  ;;  %210 = vrcp.f32 %v281_v0  ;;  %v287_v4 = vmax.f32 %v25_v2, 1e-06  ;;  %v289_v5 = vmax.f32 %v26_v3, 1e-06 }
  0x13   :  { %v58_v8 = vtrunc.f32 %v281_v0  ;;  %vm57_vm7 = vcmp.lt.f32.partialorder %v281_v0, 0 }
  0x14   :  { %v62_v6 = vtrunc.f32 %v284_v1  ;;  %v293_v7 = vand.u32 2147483647, %v287_v4  ;;  %v297_v9 = vand.u32 2147483647, %v289_v5  ;;  %vm479_vm0 = vcmp.eq.f32.partialorder %v284_v1, 2139095040 }
  0x15   :  { %vm59_vm1 = vcmp.ne.f32.partialorder %v281_v0, %v58_v8  ;;  %vm61_vm5 = vcmp.lt.f32.partialorder %v284_v1, 1266679808  ;;  %vm70_vm8 = vcmp.eq.f32.partialorder %v287_v4, 0  ;;  %vm122_vm11 = vcmp.eq.f32.partialorder %v289_v5, 0 }
  0x16   :  { %212 = vlog2.f32 %v293_v7  ;;  %v63_v10 = vcvt.f32.s32 %v62_v6  ;;  %vm305_vm2 = vmor %vm59_vm1, %vm479_vm0  ;;  %vm73_vm9 = vcmp.gt.f32.partialorder %v293_v7, 1065353216  ;;  %vm125_vm13 = vcmp.gt.f32.partialorder %v297_v9, 1065353216 }
  0x17   :  { %214 = vlog2.f32 %v297_v9  ;;  %vm66_vm4 = vmneg %vm305_vm2  ;;  %vm480_vm14 = vcmp.lt.f32.partialorder %v287_v4, 0  ;;  %v89_v22 = vsel %vm57_vm7, 0, %v249_v21  ;;  %vm72_vm0 = vcmp.lt.s32.totalorder %v287_v4, 0 }
  0x18   :  { %v64_v12 = vand.u32 1, %v63_v10  ;;  %vm326_vm12 = vmand %vm57_vm7, %vm70_vm8  ;;  %v90_v26 = vxor.u32 2147483648, %v89_v22  ;;  %v77_v28 = vsel %vm57_vm7, 2139095040, %v250_v27 }
  0x19   :  { %vm334_vm15 = vmxor %vm57_vm7, %vm73_vm9 }
  0x1a   :  { %vm65_vm3 = vcmp.eq.s32.totalorder %v64_v12, 1  ;;  %vm345_vm1 = vmand %vm57_vm7, %vm122_vm11 }
  0x1b   :  { %vm67_vm6 = vmand %vm65_vm3, %vm66_vm4 }
  0x1c   :  { %v211_v11 = vpop.eup %210  ;;  %vm317_vm10 = vmand %vm61_vm5, %vm67_vm6  ;;  %vm481_vm5 = vcmp.lt.f32.partialorder %v289_v5, 0 }
  0x1d   :  { %153 = vpush %v211_v11  ;;  %vm351_vm3 = vmxor %vm57_vm7, %vm125_vm13  ;;  %vm55_vm13 = vcmp.eq.f32.partialorder %v281_v0, 0  ;;  %vm124_vm7 = vcmp.lt.s32.totalorder %v289_v5, 0  ;;  %v91_v34 = vsel %vm317_vm10, %v90_v26, %v89_v22 }
  0x1e   :  { %vm359_vm4 = vmand %vm480_vm14, %vm305_vm2  ;;  %vm95_vm14 = vcmp.ne.f32.partialorder %v281_v0, %v281_v0 }
  0x1f   :  { %vm84_vm6 = vmor %vm326_vm12, %vm334_vm15  ;;  %vm86_vm15 = vcmp.eq.f32.partialorder %v287_v4, 3212836864 }
  0x20   :  { %v213_v14 = vpop.eup %212  ;;  %vm136_vm9 = vmor %vm345_vm1, %vm351_vm3  ;;  %v85_v31 = vsel %vm84_vm6, 2139095040, %v250_v27  ;;  %vm94_vm1 = vcmp.ne.f32.partialorder %v287_v4, %v287_v4  ;;  %vm71_vm3 = vcmp.eq.f32.partialorder %v287_v4, 1065353216  ;;  %vm74_vm6 = vcmp.eq.f32.partialorder %v293_v7, 2139095040 }
  0x21   :  { %v215_v15 = vpop.eup %214  ;;  %v51_v16 = vmul.f32 %v213_v14, %v281_v0  ;;  %vm383_vm12 = vmand %vm481_vm5, %vm305_vm2  ;;  %v137_v35 = vsel %vm136_vm9, 2139095040, %v250_v27  ;;  %vm138_vm2 = vcmp.eq.f32.partialorder %v289_v5, 3212836864  ;;  %v87_v39 = vsel %vm86_vm15, 1065353216, %v85_v31 }
  0x22   :  { %v103_v17 = vmul.f32 %v215_v15, %v281_v0  ;;  %vm79_vm5 = vmand %vm72_vm0, %vm317_vm10  ;;  %vm146_vm9 = vcmp.ne.f32.partialorder %v289_v5, %v289_v5  ;;  %v139_v44 = vsel %vm138_vm2, 1065353216, %v137_v35  ;;  %vm501_vm15 = vcmp.lt.f32.partialorder %v289_v5, 0 }
  0x23   :  { %216 = vpow2.f32 %v51_v16  ;;  %vm422_vm0 = vmor %vm94_vm1, %vm95_vm14  ;;  %v144_v46 = vsel %vm501_vm15, %v91_v34, %v89_v22  ;;  %vm502_vm1 = vcmp.eq.f32.partialorder %v284_v1, 2139095040 }
  0x24   :  { %218 = vpow2.f32 %v103_v17  ;;  %vm503_vm2 = vmmov %vm502_vm1 }
  0x2d   :  { %v217_v30 = vpop.eup %216 }
  0x2e   :  { %v219_v32 = vpop.eup %218  ;;  %v76_v33 = vsel %vm359_vm4, 2143289344, %v217_v30  ;;  %vm131_vm4 = vmand %vm124_vm7, %vm317_vm10 }
  0x2f   :  { %v78_v36 = vsel %vm70_vm8, %v77_v28, %v76_v33  ;;  %v128_v37 = vsel %vm383_vm12, 2143289344, %v219_v32  ;;  %vm498_vm8 = vcmp.lt.f32.partialorder %v287_v4, 0  ;;  %vm98_vm10 = vmor %vm71_vm3, %vm55_vm13  ;;  %vm126_vm12 = vcmp.eq.f32.partialorder %v297_v9, 2139095040 }
  0x30   :  { %v80_v38 = vxor.u32 2147483648, %v78_v36  ;;  %v130_v40 = vsel %vm122_vm11, %v77_v28, %v128_v37  ;;  %v92_v41 = vsel %vm498_vm8, %v91_v34, %v89_v22  ;;  %vm123_vm11 = vcmp.eq.f32.partialorder %v289_v5, 1065353216  ;;  %vm148_vm7 = vmor %vm146_vm9, %vm95_vm14 }
  0x31   :  { %v132_v43 = vxor.u32 2147483648, %v130_v40  ;;  %vm150_vm3 = vmor %vm123_vm11, %vm55_vm13 }
  0x32   :  { %v81_v45 = vsel %vm79_vm5, %v80_v38, %v78_v36  ;;  %vm56_vm5 = vcmp.eq.f32.partialorder %v281_v0, 1065353216 }
  0x33   :  { %v88_v47 = vsel %vm502_vm1, %v87_v39, %v81_v45  ;;  %v133_v48 = vsel %vm131_vm4, %v132_v43, %v130_v40 }
  0x34   :  { %v93_v49 = vsel %vm74_vm6, %v92_v41, %v88_v47  ;;  %v140_v50 = vsel %vm503_vm2, %v139_v44, %v133_v48 }
  0x35   :  { %v97_v51 = vsel %vm422_vm0, 2143289344, %v93_v49  ;;  %v145_v52 = vsel %vm126_vm12, %v144_v46, %v140_v50 }
  0x36   :  { %v99_v53 = vsel %vm98_vm10, 1065353216, %v97_v51  ;;  %v149_v54 = vsel %vm148_vm7, 2143289344, %v145_v52 }
  0x37   :  { %v100_v55 = vsel %vm56_vm5, %v287_v4, %v99_v53  ;;  %v151_v56 = vsel %vm150_vm3, 1065353216, %v149_v54 }
  0x38   :  { %v152_v57 = vsel %vm56_vm5, %v289_v5, %v151_v56 }
  0x39   :  { %v32_v58 = vadd.f32 %v152_v57, %v100_v55 }
  0x3b   :  { %33 = vadd.xlane.f32.xlu0 %v32_v58 }
  0x4e   :  { %s154_s0 = spop %153 }
  0x4f   :  { %v40_v59 = vstv %s154_s0 }
  0x50   :  { %v159_v62 = vand.u32 2147483647, %v40_v59  ;;  %v164_v1 = vtrunc.f32 %v40_v59  ;;  %vm163_vm8 = vcmp.lt.f32.partialorder %v40_v59, 0 }
  0x51   :  { %v195_v7 = vsel %vm163_vm8, 0, %v249_v21  ;;  %v183_v11 = vsel %vm163_vm8, 2139095040, %v250_v27 }
  0x52   :  { %v168_v0 = vtrunc.f32 %v159_v62  ;;  %vm160_vm14 = vcmp.eq.f32.partialorder %v159_v62, 2139095040  ;;  %vm165_vm13 = vcmp.ne.f32.partialorder %v40_v59, %v164_v1  ;;  %vm167_vm11 = vcmp.lt.f32.partialorder %v159_v62, 1266679808 }
  0x53   :  { %vm451_vm6 = vmor %vm165_vm13, %vm160_vm14  ;;  %v196_v9 = vxor.u32 2147483648, %v195_v7 }
  0x54   :  { %v169_v2 = vcvt.f32.s32 %v168_v0  ;;  %vm172_vm9 = vmneg %vm451_vm6 }
  0x56   :  { %v170_v6 = vand.u32 1, %v169_v2 }
  0x58   :  { %vm171_vm4 = vcmp.eq.s32.totalorder %v170_v6, 1 }
  0x59   :  { %vm173_vm10 = vmand %vm171_vm4, %vm172_vm9  ;;  %vm201_vm4 = vcmp.ne.f32.partialorder %v40_v59, %v40_v59 }
  0x5a   :  { %vm458_vm1 = vmand %vm167_vm11, %vm173_vm10  ;;  %vm161_vm10 = vcmp.eq.f32.partialorder %v40_v59, 0 }
  0x5b   :  { %v197_v15 = vsel %vm458_vm1, %v196_v9, %v195_v7 }
  0xc8   :  { %v34_v60 = vpop.xlane.xlu0 %33 }
  0xc9   :  { %v36_v61 = vmul.f32 0.00390625, %v34_v60 }
  0xcb   :  { %v155_v63 = vand.u32 2147483647, %v36_v61  ;;  %vm176_vm12 = vcmp.eq.f32.partialorder %v36_v61, 0  ;;  %vm175_vm7 = vcmp.lt.f32.partialorder %v36_v61, 0  ;;  %vm178_vm13 = vcmp.lt.s32.totalorder %v36_v61, 0 }
  0xcc   :  { %vm188_vm5 = vmand %vm163_vm8, %vm176_vm12  ;;  %vm200_vm11 = vcmp.ne.f32.partialorder %v36_v61, %v36_v61  ;;  %v198_v20 = vsel %vm175_vm7, %v197_v15, %v195_v7 }
  0xcd   :  { %220 = vlog2.f32 %v155_v63  ;;  %vm179_vm0 = vcmp.gt.f32.partialorder %v155_v63, 1065353216  ;;  %vm181_vm3 = vmand %vm175_vm7, %vm451_vm6  ;;  %vm180_vm6 = vcmp.eq.f32.partialorder %v155_v63, 2139095040 }
  0xce   :  { %vm189_vm15 = vmxor %vm163_vm8, %vm179_vm0  ;;  %vm192_vm0 = vcmp.eq.f32.partialorder %v36_v61, 3212836864 }
  0xcf   :  { %vm190_vm2 = vmor %vm188_vm5, %vm189_vm15  ;;  %vm177_vm15 = vcmp.eq.f32.partialorder %v36_v61, 1065353216  ;;  %vm42_vm5 = vcmask 7168  }
  0xd0   :  { %v191_v14 = vsel %vm190_vm2, 2139095040, %v250_v27  ;;  %vm185_vm9 = vmand %vm178_vm13, %vm458_vm1  ;;  %vm162_vm2 = vcmp.eq.f32.partialorder %v40_v59, 1065353216 }
  0xd1   :  { %v193_v18 = vsel %vm192_vm0, 1065353216, %v191_v14  ;;  %vm202_vm8 = vmor %vm200_vm11, %vm201_vm4 }
  0xd7   :  { %v221_v3 = vpop.eup %220 }
  0xd8   :  { %v157_v5 = vmul.f32 %v221_v3, %v40_v59 }
  0xda   :  { %222 = vpow2.f32 %v157_v5 }
  0xe4   :  { %v223_v10 = vpop.eup %222 }
  0xe5   :  { %v182_v12 = vsel %vm181_vm3, 2143289344, %v223_v10 }
  0xe6   :  { %v184_v13 = vsel %vm176_vm12, %v183_v11, %v182_v12  ;;  %vm204_vm12 = vmor %vm177_vm15, %vm161_vm10 }
  0xe7   :  { %v186_v16 = vxor.u32 2147483648, %v184_v13 }
  0xe9   :  { %v187_v17 = vsel %vm185_vm9, %v186_v16, %v184_v13 }
  0xea   :  { %v194_v19 = vsel %vm160_vm14, %v193_v18, %v187_v17 }
  0xeb   :  { %v199_v21 = vsel %vm180_vm6, %v198_v20, %v194_v19 }
  0xec   :  { %v203_v22 = vsel %vm202_vm8, 2143289344, %v199_v21 }
  0xed   :  { %v205_v23 = vsel %vm204_vm12, 1065353216, %v203_v22 }
  0xee   :  { %v206_v24 = vsel %vm162_vm2, %v36_v61, %v205_v23 }
  0xef   :  { %43 = vst.msk [vmem:[%s478_s2] sm:$0xff] %vm42_vm5, %v206_v24 }
  0xf0   :  { %48 = vsyncpa [#allocation4], 1 }

</bundles_post_ra>
